<compile_context>
chip_gen: v7x
topology: tpu7x:2x2x1
jax: 0.10.0
libtpu: 0.0.40
codegen_flags: <defaults>
</compile_context>

<pallas_src>
import jax
import jax.numpy as jnp
from jax.experimental import pallas as pl
from jax.experimental.pallas import tpu as pltpu


def _center_kernel(x_ref, m_ref, o_ref):
    # x_ref/o_ref: (TR, TL) VMEM tile; m_ref: (TR, 1) per-row mean column.
    # Pure VPU broadcast subtract (memory bound).
    o_ref[...] = x_ref[...] - m_ref[...]


def _round_up(v: int, m: int) -> int:
    return ((v + m - 1) // m) * m


def _cdiv(a: int, b: int) -> int:
    return (a + b - 1) // b


def _tile_params(dtype):
    """Generation-aware (target_tile_bytes, vmem_budget, sublane_pack, itemsize)."""
    itemsize = jnp.dtype(dtype).itemsize
    sub = max(8, 32 // itemsize)  # sublane packing: 8 f32, 16 bf16, 32 int8/fp8
    conservative = True
    try:
        kind = jax.devices()[0].device_kind.lower()
        # v6e / v7x: 32 MiB scoped-VMEM default -> bigger tiles pay off.
        conservative = not ("v6" in kind or "v7" in kind)
    except Exception:
        conservative = True
    if conservative:
        # v5e (and older / unknown): 16 MiB scoped-VMEM default.
        target_tile_bytes = int(2.5 * 1024 * 1024)
        vmem_budget = 14 * 1024 * 1024
    else:
        target_tile_bytes = 5 * 1024 * 1024
        vmem_budget = 26 * 1024 * 1024
    return target_tile_bytes, vmem_budget, sub, itemsize


def input_center_layer(x: jax.Array, means: jax.Array,
                       *, donate_input: bool = False) -> jax.Array:
    """x: (N, C, H, W), means: (C,) -> x - means[c] (broadcast over N, H, W)."""
    N, C, H, W = x.shape
    dtype = x.dtype
    R = N * C          # one row per (batch, channel)
    L = H * W          # lane axis: full spatial slab

    # Free 2-D view of contiguous NCHW + N-major means column (row n*C+c -> means[c]).
    x2 = x.reshape(R, L)
    m_col = jnp.tile(means.astype(dtype), N).reshape(R, 1)

    target_tile_bytes, vmem_budget, sub, itemsize = _tile_params(dtype)

    # ---- lane tile tl: full L if a minimal-height slab fits the target, else a
    # multiple of 128 (partial last lane block is masked by Pallas). -----------
    if L * itemsize * sub <= target_tile_bytes:
        tl = L
    else:
        tl = max(128, (target_tile_bytes // (sub * itemsize)) // 128 * 128)
        if tl >= L:
            tl = L

    # ---- row tile tr: hit ~target bytes per data tile while keeping in/out
    # double-buffers + the lane-padded (tr,128) means column inside VMEM. ------
    tr_by_target = target_tile_bytes // (tl * itemsize)
    tr_by_vmem = vmem_budget // ((4 * tl + 2 * 128) * itemsize)
    tr = max(sub, (min(tr_by_target, tr_by_vmem) // sub) * sub)
    if tr >= R:
        tr = R  # full-dim block: always layout-legal, no over-sized block

    n_r = _cdiv(R, tr)
    n_l = _cdiv(L, tl)

    # ---- megacore: guarantee >= 2 grid steps for non-trivial sizes so both
    # v7x TensorCores stream (harmless on single-TC chips). --------------------
    if n_r * n_l == 1 and R * L * itemsize >= (2 << 20):
        if R > sub:
            tr = min(R, _round_up(_cdiv(R, 2), sub))
        elif L > 128:
            new_tl = _round_up(_cdiv(L, 2), 128)
            if new_tl < L:
                tl = new_tl
        n_r = _cdiv(R, tr)
        n_l = _cdiv(L, tl)

    cost = pl.CostEstimate(
        flops=R * L,
        transcendentals=0,
        bytes_accessed=(2 * R * L + R) * itemsize,
    )

    out2 = pl.pallas_call(
        _center_kernel,
        out_shape=jax.ShapeDtypeStruct((R, L), dtype),
        grid_spec=pltpu.PrefetchScalarGridSpec(
            num_scalar_prefetch=0,
            grid=(n_r, n_l),
            in_specs=[
                pl.BlockSpec((tr, tl), lambda i, j: (i, j)),  # data tile
                pl.BlockSpec((tr, 1), lambda i, j: (i, 0)),   # per-row means column
            ],
            out_specs=pl.BlockSpec((tr, tl), lambda i, j: (i, j)),
        ),
        compiler_params=pltpu.CompilerParams(
            dimension_semantics=("parallel", "parallel"),
        ),
        cost_estimate=cost,
        # Only alias when the caller truly donates x; otherwise XLA would insert
        # a defensive copy (an extra HBM pass) to keep x alive.
        input_output_aliases=({0: 0} if donate_input else {}),
    )(x2, m_col)

    return out2.reshape(N, C, H, W)


if __name__ == "__main__":
    key = jax.random.PRNGKey(0)
    N, C, H, W = 2, 4, 16, 16

    # Deterministic "dataset channel means" (module __init__ arg).
    means = jnp.array([0.4914, 0.4822, 0.4465, 0.5000], dtype=jnp.float32)[:C]

    x = jax.random.uniform(key, (N, C, H, W), dtype=jnp.float32)

    out = input_center_layer(x, means)
    out = jax.block_until_ready(out)

    # Reference check (plain JAX broadcast of the PyTorch semantics).
    ref = x - means.reshape(1, C, 1, 1)
    assert out.shape == x.shape and out.dtype == x.dtype
    assert jnp.allclose(out, ref, atol=1e-6), "mismatch vs reference"

    print("KERNEL_OK")
</pallas_src>

<mosaic_0001>
module attributes {stable_mosaic.version = 11 : i64} {
  func.func @_center_kernel(%arg0: i32, %arg1: i32, %arg2: memref<8x256xf32, #tpu.memory_space<vmem>>, %arg3: memref<8x1xf32, #tpu.memory_space<vmem>>, %arg4: memref<8x256xf32, #tpu.memory_space<vmem>>) attributes {dimension_semantics = [#tpu.dimension_semantics<parallel>, #tpu.dimension_semantics<parallel>], iteration_bounds = array<i64: 1, 1>, scalar_prefetch = 0 : i64, scratch_operands = 0 : i64, tpu.core_type = #tpu.core_type<tc>, window_params = [{transform_indices = @transform_0, window_bounds = array<i64: 8, 256>}, {transform_indices = @transform_1, window_bounds = array<i64: 8, 1>}, {transform_indices = @transform_2, window_bounds = array<i64: 8, 256>}]} {
    %c0 = arith.constant 0 : index
    %c0_0 = arith.constant 0 : index
    %0 = vector.load %arg2[%c0, %c0_0] : memref<8x256xf32, #tpu.memory_space<vmem>>, vector<8x256xf32>
    %c0_1 = arith.constant 0 : index
    %c0_2 = arith.constant 0 : index
    %1 = vector.load %arg3[%c0_1, %c0_2] : memref<8x1xf32, #tpu.memory_space<vmem>>, vector<8x1xf32>
    %2 = vector.broadcast %1 : vector<8x1xf32> to vector<8x256xf32>
    %3 = arith.subf %0, %2 : vector<8x256xf32>
    %c0_3 = arith.constant 0 : index
    %c0_4 = arith.constant 0 : index
    %4 = vector.load %arg4[%c0_3, %c0_4] : memref<8x256xf32, #tpu.memory_space<vmem>>, vector<8x256xf32>
    tpu.vector_store %arg4[%c0_3, %c0_4], %3 {strides = array<i32>} : memref<8x256xf32, #tpu.memory_space<vmem>>, vector<8x256xf32>,
    return
  }
  func.func @transform_0(%arg0: i32, %arg1: i32) -> (i32, i32) {
    %c0_i32 = arith.constant 0 : i32
    return %arg0, %arg1 : i32, i32
  }
  func.func @transform_1(%arg0: i32, %arg1: i32) -> (i32, i32) {
    %c0_i32 = arith.constant 0 : i32
    %c0_i32_0 = arith.constant 0 : i32
    return %arg0, %c0_i32 : i32, i32
  }
  func.func @transform_2(%arg0: i32, %arg1: i32) -> (i32, i32) {
    %c0_i32 = arith.constant 0 : i32
    return %arg0, %arg1 : i32, i32
  }
}

</mosaic_0001>

<bundles_post_ra>
// kernel: tpu_custom_call.1
= control target key start
LH: loop header
LB: loop body
LE: loop exit
PB: predicated region body
PF: predicated region fallthrough
CT: control target
= control target key end

     0   :  { %7 = vsyncpa [#allocation3], 0  ;;  %s148_s0 = inlined_call_operand.hbm [shape: f32[8,256], index: 0, kind: input, shape index: {}]   ;;  %s149_s1 = inlined_call_operand.vmem [shape: f32[8,1], index: 1, kind: input, shape index: {}]   ;;  %s150_s2 = inlined_call_operand.hbm [shape: f32[8,256], index: 2, kind: output, shape index: {}]  }
   0x1   :  { %8 = vsyncpa [#allocation4], 0  ;;  %s103_s9 = smov [#allocation2]   ;;  %s55_s13 = scalar_lea.hbm %s148_s0, 256 }
   0x2   :  { %s15_s10 = sshll.u32 %s103_s9, 4  ;;  %p56_p0 = scmp.ne.s32.totalorder %s148_s0, %s55_s13  ;;  %s16_s10 = int_to_ptr.vmem [resolvable:$true] %s15_s10 }
   0x3   :  { %p59_p1 = scmp.lt.u32.totalorder %s55_s13, %s148_s0 }
   0x5   :  { %p61_p2 = pnand %p59_p1, %p56_p0 }
   0x7   :  { %64 = shalt.err (!%p61_p2)
}
   0x8   :  { %s65_s18 = scalar_lea.vmem %s16_s10, 256  ;;  %p70_p4 = scmp.lt.s32.totalorder %s16_s10, %s16_s10 }
   0x9   :  { %p66_p3 = scmp.ne.s32.totalorder %s16_s10, %s65_s18  ;;  %p71_p5 = scmp.lt.s32.totalorder %s65_s18, %s65_s18 }
   0xb   :  { %p72_p6 = por %p71_p5, %p70_p4 }
   0xd   :  { %p73_p7 = pnand %p72_p6, %p66_p3 }
   0xf   :  { %76 = shalt.err (!%p73_p7)
}
  0x10   :  { %18 = dma.hbm_to_vmem [thread:$0]  %s148_s0, 256, %s16_s10, [#allocation3]  }
  0x11   :  { %99 = dma.done.wait [#allocation3], 256  }
  0x12   :  { %100 = vsyncadd [#allocation3], 4294967040  ;;  %v104_v0 = vmov 0   ;;  %v26_v1 = vld [vmem:[%s149_s1] sm:$0xff]  ;;  %v25_v3 = vld [vmem:[#allocation2 + $0x8] sm:$0xff]  ;;  %s105_s23 = smov [#allocation5]  }
  0x13   :  { %54 = vset.pattern.permute.xlu0 %v104_v0  ;;  %v24_v2 = vld [vmem:[#allocation2] sm:$0xff]  ;;  %s42_s24 = sshll.u32 %s105_s23, 4  ;;  %s43_s24 = int_to_ptr.vmem [resolvable:$true] %s42_s24 }
  0x14   :  { %29 = vperm.xlu0 %54, %v26_v1   ;;  %s77_s0 = scalar_lea.vmem %s43_s24, 256  ;;  %p82_p9 = scmp.lt.s32.totalorder %s43_s24, %s43_s24 }
  0x15   :  { %p78_p8 = scmp.ne.s32.totalorder %s43_s24, %s77_s0  ;;  %p83_p10 = scmp.lt.s32.totalorder %s77_s0, %s77_s0 }
  0x17   :  { %p84_p11 = por %p83_p10, %p82_p9 }
  0x19   :  { %p85_p12 = pnand %p84_p11, %p78_p8 }
  0x93   :  { %v30_v4 = vpop.permute.xlu0 %29 }
  0x94   :  { %v32_v5 = vsub.f32 %v24_v2, %v30_v4  ;;  %v33_v6 = vsub.f32 %v25_v3, %v30_v4 }
  0x96   :  { %34 = vst [vmem:[#allocation5] sm:$0xff] %v32_v5  ;;  %35 = vst [vmem:[#allocation5 + $0x8] sm:$0xff] %v33_v6 }
  0x97   :  { %88 = shalt.err (!%p85_p12)
}
  0x98   :  { %s89_s26 = scalar_lea.hbm %s150_s2, 256 }
  0x99   :  { %p90_p13 = scmp.ne.s32.totalorder %s150_s2, %s89_s26  ;;  %p93_p0 = scmp.lt.u32.totalorder %s89_s26, %s150_s2 }
  0x9b   :  { %p95_p1 = pnand %p93_p0, %p90_p13 }
  0x9d   :  { %98 = shalt.err (!%p95_p1)
}
  0x9e   :  { %45 = dma.vmem_to_hbm [thread:$0]  %s43_s24, 256, %s150_s2, [#allocation4]  }
  0x9f   :  { %101 = dma.done.wait [#allocation4], 256  }
  0xa0   :  { %102 = vsyncadd [#allocation4], 4294967040 }
  0xa1   :  { %49 = vsyncpa [#allocation3], 1 }
  0xa2   :  { %50 = vsyncpa [#allocation4], 1 }

</bundles_post_ra>
